<compile_context>
chip_gen: v7x
topology: tpu7x:2x2x1
jax: 0.10.0
libtpu: 0.0.40
codegen_flags: <defaults>
</compile_context>

<pallas_src>
import jax
import jax.numpy as jnp
import numpy as np
from jax.experimental import pallas as pl
from jax.experimental.pallas import tpu as pltpu

_LANE = 128


def _make_mlp_kernel(n_mid, compute_dtype):
    """Feature-major fused MLP kernel.

    Refs (in order):
      x_ref:      (in_dim, tb)           input tile, batch on lanes
      w_refs:     1 + n_mid of (out, in) hidden-chain weights (VMEM-resident)
      wlast_ref:  (h_last, 1) f32        final-layer weight column
      b_refs:     1 + n_mid of (out, 1)  hidden-chain biases
      blast_ref:  (1, 1) f32 in SMEM     final-layer bias scalar
      out_ref:    (2, tb)                row 0 = logits, row 1 = sigmoid(logits)
    """

    def kernel(*refs):
        idx = 0
        x_ref = refs[idx]; idx += 1
        w_refs = refs[idx:idx + 1 + n_mid]; idx += 1 + n_mid
        wlast_ref = refs[idx]; idx += 1
        b_refs = refs[idx:idx + 1 + n_mid]; idx += 1 + n_mid
        blast_ref = refs[idx]; idx += 1
        out_ref = refs[idx]

        # Hidden chain: h_l = tanh(W_l @ h_{l-1} + b_l).  Single merged K=16
        # dot for layer 0 (input already concatenated feature-major).  In the
        # bf16 path everything stays bf16 (no per-layer casts).
        h = x_ref[...]
        for l in range(1 + n_mid):
            z = jnp.dot(w_refs[l][...], h,
                        preferred_element_type=compute_dtype) + b_refs[l][...]
            h = jnp.tanh(z)

        # Final Linear(h_last -> 1): VPU mul + sublane (XLU) reduce in f32;
        # bias is an SMEM scalar.  Result is a lane-dense (1, tb) row.
        hf = h.astype(jnp.float32)
        logits = (jnp.sum(hf * wlast_ref[...], axis=0, keepdims=True)
                  + blast_ref[0, 0])
        probs = jax.nn.sigmoid(logits)

        # Single lane-dense store of the (2, tb) block.
        out_ref[...] = jnp.concatenate([logits, probs], axis=0).astype(out_ref.dtype)

    return kernel


def vector_sa2d_forward(s, a, weights, biases, *, block_b=4096,
                        use_bf16_matmul=False):
    """VectorSA2D forward pass with one fused Pallas kernel.

    Args:
      s: (B, s_dim) float array.
      a: (B, a_dim) float array.
      weights: list of (in_i, out_i) arrays (PyTorch Linear weights transposed).
      biases:  list of (1, out_i) arrays.
      block_b: batch tile size in lanes (rounded to a multiple of 128).
      use_bf16_matmul: keep the hidden chain in bf16 end-to-end (v6e/v7x);
        final reduce + sigmoid stay f32.
    Returns:
      (logits, probs): each (B, 1) float32 — parameters of Independent(Bernoulli).
    """
    B, s_dim = s.shape
    a_dim = a.shape[1]
    in_dim = s_dim + a_dim
    n_layers = len(weights)
    assert n_layers >= 2, "expect at least one hidden layer + output layer"
    n_mid = n_layers - 2

    compute_dtype = jnp.bfloat16 if use_bf16_matmul else jnp.float32

    # ---- layout plumbing (wrapper side, once per trace) ----
    # Feature-major input: x = concat(s, a, -1)^T -> (in_dim, B), batch on lanes.
    # The kernel is MXU/EUP/overhead-bound, not HBM-bound, so this wrapper
    # concat+transpose is cheap and buys a merged layer-0 dot + lane density.
    x = jnp.concatenate([jnp.asarray(s, jnp.float32),
                         jnp.asarray(a, jnp.float32)], axis=-1).T
    x = x.astype(compute_dtype)

    # Hidden-chain weights as (out, in) so each layer is W @ h.
    w_chain = [jnp.asarray(w, jnp.float32).T.astype(compute_dtype)
               for w in weights[:-1]]
    b_chain = [jnp.asarray(b, jnp.float32).reshape(-1, 1).astype(compute_dtype)
               for b in biases[:-1]]
    w_last = jnp.asarray(weights[-1], jnp.float32).reshape(-1, 1)   # (h_last, 1)
    b_last = jnp.asarray(biases[-1], jnp.float32).reshape(1, 1)     # SMEM scalar

    # ---- batch tile on the lane axis ----
    if B <= _LANE:
        tb = B                                   # single small tile
    else:
        tb = min(block_b, B)
        tb = max(_LANE, (tb // _LANE) * _LANE)   # lane-dense multiple of 128
        if tb >= B:
            # Guarantee >=2 tiles so the "parallel" axis can shard across
            # both TensorCores on v7x.
            tb = max(_LANE, ((B // 2) // _LANE) * _LANE)
    grid = (pl.cdiv(B, tb),)

    def resident(arr):
        # Whole-array block with a constant index_map -> parameter stays
        # VMEM-resident across all batch tiles (no per-tile re-DMA).
        return pl.BlockSpec(arr.shape, lambda i: (0, 0))

    in_specs = (
        [pl.BlockSpec((in_dim, tb), lambda i: (0, i))]
        + [resident(w) for w in w_chain]
        + [resident(w_last)]
        + [resident(b) for b in b_chain]
        + [pl.BlockSpec(memory_space=pltpu.MemorySpace.SMEM)]       # b_last scalar
    )

    fused = pl.pallas_call(
        _make_mlp_kernel(n_mid, compute_dtype),
        grid=grid,
        out_shape=jax.ShapeDtypeStruct((2, B), jnp.float32),
        in_specs=in_specs,
        out_specs=pl.BlockSpec((2, tb), lambda i: (0, i)),
        compiler_params=pltpu.CompilerParams(
            dimension_semantics=("parallel",)),   # megacore sharding on v7x
    )(x, *w_chain, w_last, *b_chain, b_last)

    logits = fused[0:1, :].T     # (B, 1)
    probs = fused[1:2, :].T      # (B, 1)
    return logits, probs


def init_params(key, in_dim, hidden_units, out_dim=1):
    """Deterministic parameter init (PyTorch-Linear-style uniform bounds)."""
    dims = [in_dim] + list(hidden_units) + [out_dim]
    weights, biases = [], []
    for i in range(len(dims) - 1):
        fan_in, fan_out = dims[i], dims[i + 1]
        key, kw, kb = jax.random.split(key, 3)
        bound = 1.0 / np.sqrt(fan_in)
        w = jax.random.uniform(kw, (fan_in, fan_out), jnp.float32, -bound, bound)
        b = jax.random.uniform(kb, (1, fan_out), jnp.float32, -bound, bound)
        weights.append(w)
        biases.append(b)
    return weights, biases


def reference_forward(s, a, weights, biases):
    """Pure-JAX reference for correctness checking."""
    h = jnp.concatenate([s, a], axis=-1).astype(jnp.float32)
    n = len(weights)
    for i in range(n):
        z = h @ weights[i] + biases[i]
        h = jnp.tanh(z) if i < n - 1 else z
    return h, jax.nn.sigmoid(h)


if __name__ == "__main__":
    S_DIM, A_DIM = 12, 4
    HIDDEN_UNITS = (32, 32)

    key = jax.random.PRNGKey(0)
    key, ks, ka, kp = jax.random.split(key, 4)
    weights, biases = init_params(kp, S_DIM + A_DIM, HIDDEN_UNITS, out_dim=1)

    # (1) Gridded path: B=256 -> tb=128 (>=2 tiles so both v7x TCs are used),
    #     resident parameters, feature-major lane-dense tiles.
    B = 256
    s = jax.random.normal(ks, (B, S_DIM), jnp.float32)
    a = jax.random.normal(ka, (B, A_DIM), jnp.float32)

    logits, probs = vector_sa2d_forward(s, a, weights, biases)
    jax.block_until_ready((logits, probs))

    ref_logits, ref_probs = reference_forward(s, a, weights, biases)
    assert logits.shape == (B, 1) and probs.shape == (B, 1)
    np.testing.assert_allclose(np.asarray(logits), np.asarray(ref_logits),
                               rtol=1e-5, atol=1e-5)
    np.testing.assert_allclose(np.asarray(probs), np.asarray(ref_probs),
                               rtol=1e-5, atol=1e-5)

    # (2) Partial-lane tile path: B=200 -> tb=128, second tile is partial
    #     (masked output writeback; padded lanes never contaminate valid ones).
    Bp = 200
    logits_p, probs_p = vector_sa2d_forward(s[:Bp], a[:Bp], weights, biases)
    jax.block_until_ready((logits_p, probs_p))
    np.testing.assert_allclose(np.asarray(logits_p), np.asarray(ref_logits[:Bp]),
                               rtol=1e-5, atol=1e-5)
    np.testing.assert_allclose(np.asarray(probs_p), np.asarray(ref_probs[:Bp]),
                               rtol=1e-5, atol=1e-5)

    # (3) Tiny-batch path (single block, tb == B == 8).
    Bs = 8
    logits8, probs8 = vector_sa2d_forward(s[:Bs], a[:Bs], weights, biases)
    jax.block_until_ready((logits8, probs8))
    np.testing.assert_allclose(np.asarray(logits8), np.asarray(ref_logits[:Bs]),
                               rtol=1e-5, atol=1e-5)
    np.testing.assert_allclose(np.asarray(probs8), np.asarray(ref_probs[:Bs]),
                               rtol=1e-5, atol=1e-5)

    # (4) bf16 hidden-chain variant (v6e/v7x); looser tolerance from bf16
    #     matmul inputs/activations (final reduce + sigmoid stay f32).
    logits_bf, probs_bf = vector_sa2d_forward(s, a, weights, biases,
                                              use_bf16_matmul=True)
    jax.block_until_ready((logits_bf, probs_bf))
    np.testing.assert_allclose(np.asarray(logits_bf), np.asarray(ref_logits),
                               rtol=5e-2, atol=5e-2)
    np.testing.assert_allclose(np.asarray(probs_bf), np.asarray(ref_probs),
                               rtol=5e-2, atol=5e-2)

    # TODO(synk): torch.distributions.Independent(Bernoulli) is a distribution
    # object with no tensor equivalent; the kernel returns its parameters
    # (logits, probs = sigmoid(logits)).
    print("KERNEL_OK")
</pallas_src>

<mosaic_0001>
module attributes {stable_mosaic.version = 11 : i64} {
  func.func @kernel(%arg0: i32, %arg1: memref<16x128xf32, #tpu.memory_space<vmem>>, %arg2: memref<32x16xf32, #tpu.memory_space<vmem>>, %arg3: memref<32x32xf32, #tpu.memory_space<vmem>>, %arg4: memref<32x1xf32, #tpu.memory_space<vmem>>, %arg5: memref<32x1xf32, #tpu.memory_space<vmem>>, %arg6: memref<32x1xf32, #tpu.memory_space<vmem>>, %arg7: memref<1x1xf32, #tpu.memory_space<smem>>, %arg8: memref<2x128xf32, #tpu.memory_space<vmem>>) attributes {dimension_semantics = [#tpu.dimension_semantics<parallel>], iteration_bounds = array<i64: 2>, scalar_prefetch = 0 : i64, scratch_operands = 0 : i64, tpu.core_type = #tpu.core_type<tc>, window_params = [{transform_indices = @transform_0, window_bounds = array<i64: 16, 128>}, {pipeline_mode = #tpu.pipeline_mode<synchronous>, transform_indices = @transform_1, window_bounds = array<i64: 32, 16>}, {pipeline_mode = #tpu.pipeline_mode<synchronous>, transform_indices = @transform_2, window_bounds = array<i64: 32, 32>}, {pipeline_mode = #tpu.pipeline_mode<synchronous>, transform_indices = @transform_3, window_bounds = array<i64: 32, 1>}, {pipeline_mode = #tpu.pipeline_mode<synchronous>, transform_indices = @transform_4, window_bounds = array<i64: 32, 1>}, {pipeline_mode = #tpu.pipeline_mode<synchronous>, transform_indices = @transform_5, window_bounds = array<i64: 32, 1>}, {transform_indices = @transform_6, window_bounds = array<i64: 1, 1>}, {transform_indices = @transform_7, window_bounds = array<i64: 2, 128>}]} {
    %c0 = arith.constant 0 : index
    %c0_0 = arith.constant 0 : index
    %0 = vector.load %arg1[%c0, %c0_0] : memref<16x128xf32, #tpu.memory_space<vmem>>, vector<16x128xf32>
    %c0_1 = arith.constant 0 : index
    %c0_2 = arith.constant 0 : index
    %1 = vector.load %arg2[%c0_1, %c0_2] : memref<32x16xf32, #tpu.memory_space<vmem>>, vector<32x16xf32>
    %cst = arith.constant dense<0.000000e+00> : vector<32x128xf32>
    %2 = tpu.matmul %1, %0, %cst {dimension_numbers = #tpu.dot_dimension_numbers<[1], [0], [0], [1], [0, 0, 1, 1], [], []>} : vector<32x16xf32>, vector<16x128xf32>, vector<32x128xf32> -> vector<32x128xf32>
    %c0_3 = arith.constant 0 : index
    %c0_4 = arith.constant 0 : index
    %3 = vector.load %arg5[%c0_3, %c0_4] : memref<32x1xf32, #tpu.memory_space<vmem>>, vector<32x1xf32>
    %4 = vector.broadcast %3 : vector<32x1xf32> to vector<32x128xf32>
    %5 = arith.addf %2, %4 : vector<32x128xf32>
    %6 = math.tanh %5 : vector<32x128xf32>
    %c0_5 = arith.constant 0 : index
    %c0_6 = arith.constant 0 : index
    %7 = vector.load %arg3[%c0_5, %c0_6] : memref<32x32xf32, #tpu.memory_space<vmem>>, vector<32x32xf32>
    %cst_7 = arith.constant dense<0.000000e+00> : vector<32x128xf32>
    %8 = tpu.matmul %7, %6, %cst_7 {dimension_numbers = #tpu.dot_dimension_numbers<[1], [0], [0], [1], [0, 0, 1, 1], [], []>} : vector<32x32xf32>, vector<32x128xf32>, vector<32x128xf32> -> vector<32x128xf32>
    %c0_8 = arith.constant 0 : index
    %c0_9 = arith.constant 0 : index
    %9 = vector.load %arg6[%c0_8, %c0_9] : memref<32x1xf32, #tpu.memory_space<vmem>>, vector<32x1xf32>
    %10 = vector.broadcast %9 : vector<32x1xf32> to vector<32x128xf32>
    %11 = arith.addf %8, %10 : vector<32x128xf32>
    %12 = math.tanh %11 : vector<32x128xf32>
    %c0_10 = arith.constant 0 : index
    %c0_11 = arith.constant 0 : index
    %13 = vector.load %arg4[%c0_10, %c0_11] : memref<32x1xf32, #tpu.memory_space<vmem>>, vector<32x1xf32>
    %14 = vector.broadcast %13 : vector<32x1xf32> to vector<32x128xf32>
    %15 = arith.mulf %12, %14 : vector<32x128xf32>
    %cst_12 = arith.constant dense<0.000000e+00> : vector<128xf32>
    %16 = vector.multi_reduction <add>, %15, %cst_12 [0] : vector<32x128xf32> to vector<128xf32>
    %17 = vector.shape_cast %16 : vector<128xf32> to vector<1x128xf32>
    %c0_13 = arith.constant 0 : index
    %c0_14 = arith.constant 0 : index
    %18 = memref.load %arg7[%c0_13, %c0_14] : memref<1x1xf32, #tpu.memory_space<smem>>
    %19 = vector.broadcast %18 : f32 to vector<1x128xf32>
    %20 = arith.addf %17, %19 : vector<1x128xf32>
    %21 = arith.negf %20 : vector<1x128xf32>
    %22 = math.exp %21 : vector<1x128xf32>
    %cst_15 = arith.constant 1.000000e+00 : f32
    %23 = vector.broadcast %cst_15 : f32 to vector<1x128xf32>
    %24 = arith.addf %23, %22 : vector<1x128xf32>
    %25 = arith.divf %23, %24 : vector<1x128xf32>
    %26 = tpu.concatenate %20, %25 in 0 : vector<1x128xf32>, vector<1x128xf32> -> vector<2x128xf32>
    %c0_16 = arith.constant 0 : index
    %c0_17 = arith.constant 0 : index
    %27 = vector.load %arg8[%c0_16, %c0_17] : memref<2x128xf32, #tpu.memory_space<vmem>>, vector<2x128xf32>
    tpu.vector_store %arg8[%c0_16, %c0_17], %26 {strides = array<i32>} : memref<2x128xf32, #tpu.memory_space<vmem>>, vector<2x128xf32>,
    return
  }
  func.func @transform_0(%arg0: i32) -> (i32, i32) {
    %c0_i32 = arith.constant 0 : i32
    %c0_i32_0 = arith.constant 0 : i32
    return %c0_i32, %arg0 : i32, i32
  }
  func.func @transform_1(%arg0: i32) -> (i32, i32) {
    %c0_i32 = arith.constant 0 : i32
    %c0_i32_0 = arith.constant 0 : i32
    %c0_i32_1 = arith.constant 0 : i32
    return %c0_i32, %c0_i32_0 : i32, i32
  }
  func.func @transform_2(%arg0: i32) -> (i32, i32) {
    %c0_i32 = arith.constant 0 : i32
    %c0_i32_0 = arith.constant 0 : i32
    %c0_i32_1 = arith.constant 0 : i32
    return %c0_i32, %c0_i32_0 : i32, i32
  }
  func.func @transform_3(%arg0: i32) -> (i32, i32) {
    %c0_i32 = arith.constant 0 : i32
    %c0_i32_0 = arith.constant 0 : i32
    %c0_i32_1 = arith.constant 0 : i32
    return %c0_i32, %c0_i32_0 : i32, i32
  }
  func.func @transform_4(%arg0: i32) -> (i32, i32) {
    %c0_i32 = arith.constant 0 : i32
    %c0_i32_0 = arith.constant 0 : i32
    %c0_i32_1 = arith.constant 0 : i32
    return %c0_i32, %c0_i32_0 : i32, i32
  }
  func.func @transform_5(%arg0: i32) -> (i32, i32) {
    %c0_i32 = arith.constant 0 : i32
    %c0_i32_0 = arith.constant 0 : i32
    %c0_i32_1 = arith.constant 0 : i32
    return %c0_i32, %c0_i32_0 : i32, i32
  }
  func.func @transform_6(%arg0: i32) -> (i32, i32) {
    %c0_i32 = arith.constant 0 : i32
    %c0_i32_0 = arith.constant 0 : i32
    %c0_i32_1 = arith.constant 0 : i32
    return %c0_i32, %c0_i32_0 : i32, i32
  }
  func.func @transform_7(%arg0: i32) -> (i32, i32) {
    %c0_i32 = arith.constant 0 : i32
    %c0_i32_0 = arith.constant 0 : i32
    return %c0_i32, %arg0 : i32, i32
  }
}

</mosaic_0001>

<bundles_post_ra>
// kernel: tpu_custom_call.1
= control target key start
LH: loop header
LB: loop body
LE: loop exit
PB: predicated region body
PF: predicated region fallthrough
CT: control target
= control target key end

     0   :  { %s1126_s0 = inlined_call_operand.vmem [shape: f32[16,256], index: 0, kind: input, shape index: {}]   ;;  %s1127_s1 = inlined_call_operand.vmem [shape: f32[32,16], index: 1, kind: input, shape index: {}]   ;;  %s1128_s2 = inlined_call_operand.vmem [shape: f32[32,32], index: 2, kind: input, shape index: {}]   ;;  %s1129_s3 = inlined_call_operand.vmem [shape: f32[32,1], index: 3, kind: input, shape index: {}]   ;;  %s1130_s4 = inlined_call_operand.vmem [shape: f32[32,1], index: 4, kind: input, shape index: {}]   ;;  %s1131_s5 = inlined_call_operand.vmem [shape: f32[32,1], index: 5, kind: input, shape index: {}]   ;;  %s1132_s6 = inlined_call_operand.<no memory space> [shape: f32[1,1], index: 6, kind: input, shape index: {}]   ;;  %s1133_s7 = inlined_call_operand.hbm [shape: f32[2,256], index: 7, kind: output, shape index: {}]  }
   0x1   :  { %12 = sst [smem:[#allocation2]] %s1132_s6 }
   0x2   :  { %13 = vsyncpa [#allocation5], 0 }
   0x3   :  { %15 = vsyncpa [#allocation5 + $0x1], 0  ;;  %s948_s26 = smov 0   ;;  %s950_s27 = smov 0  }
   0x4   :  { %s952_s28 = smov 0   ;;  %s954_s29 = smov 0  }
   0x5 LB: > { %s705_s6 = sadd.s32 4294967295, %s901_s29   ;;  %s706_s30 = sadd.s32 4294967294, %s901_s29   ;;  %s901_s29 = sphi %s954_s29, %s1139_s29   ;;  %s897_s28 = sphi %s952_s28, %s1138_s28   ;;  %s893_s27 = sphi %s950_s27, %s1137_s27   ;;  %s889_s26 = sphi %s948_s26, %s1136_s26  }
   0x6   : > { %s971_s8 = sadd.s32 1, %s901_s29   ;;  %s28_s9 = sadd.s32 1, %s897_s28 }
   0x7   : > { %s25_s10 = ssub.s32 %s901_s29, %s971_s8  ;;  %p35_p0 = scmp.ne.s32.totalorder %s897_s28, %s893_s27 }
   0x8   : > { %p26_p1 = scmp.eq.s32.totalorder %s25_s10, 0  ;;  %p36_p2 = scmp.eq.s32.totalorder %s901_s29, 0 }
   0x9   : > { %p191_p3 = scmp.eq.s32.totalorder %s705_s6, 1  ;;  %p196_p4 = scmp.ne.s32.totalorder %s893_s27, %s889_s26 }
   0xa   : > { %s984_s11 = scalar_select %p26_p1, %s897_s28, %s28_s9  }
   0xb   : > { %p37_p5 = por %p36_p2, %p35_p0  ;;  %p986_p6 = por %p191_p3, %p35_p0 }
   0xc   : > { %p197_p7 = scmp.eq.s32.totalorder %s706_s30, 1  ;;  %p708_p9 = scmp.ge.s32.totalorder %s901_s29, 2 }
   0xe   : > { %p990_p8 = por %p197_p7, %p196_p4  ;;  %231 = sbr.rel (%p708_p9) target bundleno = 28 (0x1c), region = 40 }
  0x15   : > { %234 = sbr.rel (!%p37_p5) target bundleno = 28 (0x1c), region = 44  ;;  %s236_s14 = sand.u32 (%p37_p5), 1, %s897_s28  }
  0x16   : > { %s710_s15 = sshll.u32 (%p37_p5), %s901_s29, 3  ;;  %s709_s16 = sshll.u32 (%p37_p5), %s236_s14, 4 }
  0x17   : > { %s240_s19 = scalar_lea.vmem (%p37_p5), %s1126_s0, %s710_s15  ;;  %s238_s20 = scalar_lea.vmem (%p37_p5), [#allocation3], %s709_s16 }
  0x18   : > { %v270_v0 = vld [vmem:[%s240_s19] sm:$0xff] (%p37_p5)  ;;  %v272_v1 = vld [vmem:[%s240_s19 + $0x10] sm:$0xff] (%p37_p5) }
  0x19   : > { %271 = vst [vmem:[%s238_s20] sm:$0xff] (%p37_p5), %v270_v0  ;;  %273 = vst [vmem:[%s238_s20 + $0x8] sm:$0xff] (%p37_p5), %v272_v1 }
  0x1c PF: > { %p711_p10 = scmp.ge.s32.totalorder %s901_s29, 1  ;;  %p278_p11 = scmp.lt.s32.totalorder %s901_s29, 3 }
  0x1e   : > { %p279_p12 = pnand %p711_p10, %p278_p11 }
  0x1f   : > { %s1005_s21 = sand.u32 (!%p279_p12), 1, %s893_s27   ;;  %v318_v2 = vld [vmem:[%s1127_s1] sm:$0xff] (!%p279_p12)  ;;  %vm346_vm0 = vcmask (!%p279_p12), 130048   ;;  %v903_v3 = vmov (!%p279_p12), 0   ;;  %v324_v5 = vld [vmem:[%s1130_s4 + $0x10] sm:$0xff] (!%p279_p12)  ;;  %v323_v8 = vld [vmem:[%s1130_s4 + $0x8] sm:$0xff] (!%p279_p12) }
  0x20   : > { %282 = sbr.rel (%p279_p12) target bundleno = 568 (0x238), region = 82  ;;  %s712_s24 = sshll.u32 (!%p279_p12), %s1005_s21, 4  ;;  %745 = vmatprep.mubr.msk.f32.mxu0 (!%p279_p12), %vm346_vm0, %v318_v2  ;;  %817 = vset.pattern.permute.xlu0 (!%p279_p12), %v903_v3  ;;  %v322_v4 = vld [vmem:[%s1130_s4] sm:$0xff] (!%p279_p12)  ;;  %v325_v10 = vld [vmem:[%s1130_s4 + $0x18] sm:$0xff] (!%p279_p12)  ;;  %v319_v11 = vld [vmem:[%s1127_s1 + $0x8] sm:$0xff] (!%p279_p12)  ;;  %vm476_vm1 = vcmask (!%p279_p12), 261120  }
  0x21   : > { %328 = vperm.xlu0 (!%p279_p12), %817, %v322_v4   ;;  %818 = vset.pattern.permute.xlu1 (!%p279_p12), %v903_v3  ;;  %s287_s14 = scalar_lea.vmem (!%p279_p12), [#allocation3], %s712_s24  ;;  %v452_v12 = vld [vmem:[%s1131_s5] sm:$0xff] (!%p279_p12)  ;;  %v320_v13 = vld [vmem:[%s1127_s1 + $0x10] sm:$0xff] (!%p279_p12)  ;;  %v453_v14 = vld [vmem:[%s1131_s5 + $0x8] sm:$0xff] (!%p279_p12)  ;;  %s615_s22 = sld [smem:[#allocation2]] (!%p279_p12)  ;;  %vm624_vm2 = vcmask (!%p279_p12), 1040384  }
  0x22   : > { %v316_v6 = vld [vmem:[%s287_s14] sm:$0xff] (!%p279_p12)  ;;  %v317_v7 = vld [vmem:[%s287_s14 + $0x8] sm:$0xff] (!%p279_p12)  ;;  %338 = vperm.xlu1 (!%p279_p12), %818, %v324_v5   ;;  %s713_s23 = sshll.u32 (!%p279_p12), %s1005_s21, 1  ;;  %s724_s24 = sshll.u32 (!%p279_p12), %s705_s6, 5 }
  0x23   : > { %v765_v9 = vpack.c.bf16 (!%p279_p12), %v317_v7, %v316_v6  ;;  %v321_v15 = vld [vmem:[%s1127_s1 + $0x18] sm:$0xff] (!%p279_p12)  ;;  %v454_v16 = vld [vmem:[%s1131_s5 + $0x10] sm:$0xff] (!%p279_p12)  ;;  %v578_v18 = vld [vmem:[%s1129_s3] sm:$0xff] (!%p279_p12)  ;;  %s315_s25 = scalar_lea.vmem (!%p279_p12), [#allocation4], %s713_s23  ;;  %s1082_s14 = scalar_lea.hbm (!%p279_p12), %s1133_s7, %s724_s24 }
  0x24   : > { %v455_v17 = vld [vmem:[%s1131_s5 + $0x18] sm:$0xff] (!%p279_p12)  ;;  %v579_v19 = vld [vmem:[%s1129_s3 + $0x8] sm:$0xff] (!%p279_p12)  ;;  %v580_v20 = vld [vmem:[%s1129_s3 + $0x10] sm:$0xff] (!%p279_p12)  ;;  %s641_s30 = sshll.u32 (!%p279_p12), %s315_s25, 4  ;;  %s628_s15 = scalar_lea.sflag (!%p279_p12), [#allocation5], %s1005_s21  ;;  %s1084_s30 = int_to_ptr.vmem [resolvable:$true] %s641_s30 }
  0x25   : > { %766 = vmatprep.subr.bf16.mxu0 (!%p279_p12), %v765_v9  ;;  %333 = vperm.xlu0 (!%p279_p12), %817, %v323_v8   ;;  %v581_v21 = vld [vmem:[%s1129_s3 + $0x18] sm:$0xff] (!%p279_p12)  ;;  %v448_v22 = vld [vmem:[%s1128_s2] sm:$0xff] (!%p279_p12)  ;;  %v449_v41 = vld [vmem:[%s1128_s2 + $0x8] sm:$0xff] (!%p279_p12)  ;;  %s839_s16 = scalar_lea.vmem (!%p279_p12), %s1084_s30, 32  ;;  %s904_s6 = smov (!%p279_p12), [#allocation4]  }
  0x26   : > { %768 = vmatpush3.bf16.msra.mxu0 (!%p279_p12), %v765_v9  ;;  %343 = vperm.xlu1 (!%p279_p12), %818, %v325_v10   ;;  %v450_v42 = vld [vmem:[%s1128_s2 + $0x10] sm:$0xff] (!%p279_p12)  ;;  %v451_v43 = vld [vmem:[%s1128_s2 + $0x18] sm:$0xff] (!%p279_p12)  ;;  %p840_p13 = scmp.ne.s32.totalorder (!%p279_p12), %s1084_s30, %s839_s16  ;;  %s843_s17 = sshll.u32 (!%p279_p12), %s904_s6, 4  ;;  %s844_s17 = int_to_ptr.vmem [resolvable:$false] %s843_s17 }
  0x27   : > { %759 = vmatprep.mubr.msk.f32.mxu1 %vm476_vm1, %v448_v22  ;;  %s845_s18 = scalar_lea.vmem %s844_s17, 64  ;;  %p846_p2 = scmp.lt.s32.totalorder %s1084_s30, %s844_s17 }
  0x28   : > { %p841_p0 = pnand %p840_p13, %p986_p6  ;;  %p847_p3 = scmp.lt.s32.totalorder %s845_s18, %s839_s16 }
  0x29   : > { %746 = vmatmul.mubr.msk.f32.vlgmr.msra.gmra.mrb[0].mxu0 %vm346_vm0, %v319_v11  ;;  %458 = vperm.xlu0 %817, %v452_v12   ;;  %v616_v12 = vstv %s615_s22 }
  0x2a   : > { %748 = vmatprep.mubr.msk.f32.mxu0 %vm346_vm0, %v320_v13  ;;  %463 = vperm.xlu1 %818, %v453_v14   ;;  %p842_p1 = pneg %p841_p0  ;;  %p848_p4 = por %p847_p3, %p846_p2 }
  0x2c   : > { %p849_p5 = pnand %p848_p4, %p842_p1 }
  0x2d   : > { %749 = vmatmul.mubr.msk.f32.gmra.mrb[2].mxu0 %vm346_vm0, %v321_v15  ;;  %468 = vperm.xlu0 %817, %v454_v16  }
  0x2e   : > { %473 = vperm.xlu1 %818, %v455_v17  }
  0x31   : > { %584 = vperm.xlu0 %817, %v578_v18  }
  0x32   : > { %589 = vperm.xlu1 %818, %v579_v19  }
  0x35   : > { %594 = vperm.xlu0 %817, %v580_v20  }
  0x36   : > { %599 = vperm.xlu1 %818, %v581_v21  }
  0xa0   : > { %v329_v23 = vpop.permute.xlu0 %328 }
  0xa1   : > { %v339_v24 = vpop.permute.xlu1 %338 }
  0xa4   : > { %v334_v25 = vpop.permute.xlu0 %333 }
  0xa5   : > { %v344_v30 = vpop.permute.xlu1 %343 }
  0xa8   : > { %v459_v45 = vpop.permute.xlu0 %458 }
  0xa9   : > { %v464_v44 = vpop.permute.xlu1 %463 }
  0xac   : > { %v469_v52 = vpop.permute.xlu0 %468 }
  0xad   : > { %v474_v50 = vpop.permute.xlu1 %473 }
  0xb0   : > { %v585_v56 = vpop.permute.xlu0 %584 }
  0xb1   : > { %v590_v58 = vpop.permute.xlu1 %589 }
  0xb4   : > { %v595_v1 = vpop.permute.xlu0 %594 }
  0xb5   : > { %v600_v3 = vpop.permute.xlu1 %599 }
  0xfc   : > { %v747_v26 = vpop.f32.mrb[0].mxu0 }
  0xfd   : > { %v431_v27 = vadd.f32 %v747_v26, %v334_v25  ;;  %v425_v28 = vpop.f32.mrb[1].mxu0 }
  0xfe   : > { %v426_v29 = vadd.f32 %v425_v28, %v329_v23 }
  0xff   : > { %819 = vtanh.f32 %v431_v27 }
 0x100   : > { %821 = vtanh.f32 %v426_v29  ;;  %v750_v31 = vpop.f32.mrb[2].mxu0 }
 0x101   : > { %v441_v32 = vadd.f32 %v750_v31, %v344_v30  ;;  %v435_v33 = vpop.f32.mrb[3].mxu0 }
 0x102   : > { %v436_v34 = vadd.f32 %v435_v33, %v339_v24 }
 0x103   : > { %823 = vtanh.f32 %v441_v32 }
 0x104   : > { %825 = vtanh.f32 %v436_v34 }
 0x109   : > { %v820_v35 = vpop.eup %819 }
 0x10a   : > { %v822_v36 = vpop.eup %821 }
 0x10b   : > { %v769_v37 = vpack.c.bf16 %v820_v35, %v822_v36 }
 0x10d   : > { %v824_v38 = vpop.eup %823  ;;  %770 = vmatprep.subr.bf16.mxu1 %v769_v37 }
 0x10e   : > { %v826_v39 = vpop.eup %825  ;;  %772 = vmatpush3.bf16.msra.mxu1 %v769_v37 }
 0x10f   : > { %v773_v40 = vpack.c.bf16 %v824_v38, %v826_v39 }
 0x111   : > { %774 = vmatprep.subr.bf16.mxu1 %v773_v40 }
 0x112   : > { %776 = vmatpush3.bf16.msra.mxu1 %v773_v40 }
 0x115   : > { %760 = vmatmul.mubr.msk.f32.vlgmr.msra.gmra.mrb[0].mxu1 %vm476_vm1, %v449_v41 }
 0x116   : > { %762 = vmatprep.mubr.msk.f32.mxu1 %vm476_vm1, %v450_v42 }
 0x119   : > { %763 = vmatmul.mubr.msk.f32.gmra.mrb[2].mxu1 %vm476_vm1, %v451_v43 }
 0x1e8   : > { %v761_v46 = vpop.f32.mrb[0].mxu1 }
 0x1e9   : > { %v561_v47 = vadd.f32 %v761_v46, %v464_v44  ;;  %v555_v48 = vpop.f32.mrb[1].mxu1 }
 0x1ea   : > { %v556_v49 = vadd.f32 %v555_v48, %v459_v45 }
 0x1eb   : > { %827 = vtanh.f32 %v561_v47 }
 0x1ec   : > { %829 = vtanh.f32 %v556_v49  ;;  %v764_v51 = vpop.f32.mrb[2].mxu1 }
 0x1ed   : > { %v571_v53 = vadd.f32 %v764_v51, %v474_v50  ;;  %v565_v54 = vpop.f32.mrb[3].mxu1 }
 0x1ee   : > { %v566_v55 = vadd.f32 %v565_v54, %v469_v52 }
 0x1ef   : > { %831 = vtanh.f32 %v571_v53 }
 0x1f0   : > { %833 = vtanh.f32 %v566_v55 }
 0x1f5   : > { %v828_v57 = vpop.eup %827 }
 0x1f6   : > { %v830_v59 = vpop.eup %829  ;;  %v603_v60 = vmul.f32 %v828_v57, %v590_v58 }
 0x1f7   : > { %v602_v61 = vmul.f32 %v830_v59, %v585_v56 }
 0x1f9   : > { %v832_v62 = vpop.eup %831  ;;  %v606_v63 = vadd.f32 %v603_v60, %v602_v61 }
 0x1fa   : > { %v834_v0 = vpop.eup %833  ;;  %v605_v4 = vmul.f32 %v832_v62, %v600_v3 }
 0x1fb   : > { %v604_v2 = vmul.f32 %v834_v0, %v595_v1 }
 0x1fd   : > { %v607_v5 = vadd.f32 %v606_v63, %v604_v2 }
 0x1ff   : > { %v608_v6 = vadd.f32 %v607_v5, %v605_v4 }
 0x201   : > { %v609_v7 = vrot.slane %v608_v6, 4 }
 0x203   : > { %v610_v8 = vadd.f32 %v609_v7, %v608_v6 }
 0x205   : > { %v611_v9 = vrot.slane %v610_v8, 2 }
 0x207   : > { %v612_v10 = vadd.f32 %v611_v9, %v610_v8 }
 0x209   : > { %v613_v11 = vrot.slane %v612_v10, 1 }
 0x20b   : > { %v614_v13 = vadd.f32 %v613_v11, %v612_v10 }
 0x20d   : > { %v617_v14 = vadd.f32 %v616_v12, %v614_v13 }
 0x20f   : > { %v722_v15 = vmul.f32 -1.442695, %v617_v14 }
 0x211   : > { %835 = vpow2.f32 %v722_v15 }
 0x21b   : > { %v836_v16 = vpop.eup %835 }
 0x21c   : > { %v621_v17 = vadd.f32 1.0, %v836_v16 }
 0x21e   : > { %837 = vrcp.f32 %v621_v17 }
 0x228   : > { %v838_v18 = vpop.eup %837 }
 0x229   : > { %v625_v19 = vsel %vm624_vm2, %v617_v14, %v838_v18 }
 0x22a   : > { %626 = vst [vmem:[%s315_s25] sm:$0x3] %v625_v19 }
 0x22b   : > { %852 = shalt.err (!%p849_p5)
}
 0x22c   : > { %s853_s21 = scalar_lea.hbm %s1082_s14, 32  ;;  %s857_s22 = scalar_lea.hbm %s1133_s7, 64 }
 0x22d   : > { %p854_p7 = scmp.ne.s32.totalorder %s1082_s14, %s853_s21  ;;  %p858_p12 = scmp.lt.u32.totalorder %s1082_s14, %s1133_s7 }
 0x22e   : > { %p859_p13 = scmp.lt.u32.totalorder %s857_s22, %s853_s21  ;;  %p861_p1 = scmp.lt.u32.totalorder %s853_s21, %s1082_s14 }
 0x22f   : > { %p855_p10 = pnand %p854_p7, %p986_p6 }
 0x230   : > { %p860_p0 = por %p859_p13, %p858_p12 }
 0x231   : > { %p856_p11 = pneg %p855_p10 }
 0x232   : > { %p862_p2 = por %p861_p1, %p860_p0 }
 0x234   : > { %p863_p3 = pnand %p862_p2, %p856_p11 }
 0x236   : > { %866 = shalt.err (!%p863_p3)
}
 0x237   : > { %777 = dma.vmem_to_hbm [thread:$0]  (%p986_p6), %s1084_s30, 32, %s1082_s14, %s628_s15  }
 0x238 PF: > { %s653_s25 = sand.u32 1, %s889_s26   ;;  %p780_p4 = pnand %p708_p9, %p990_p8 }
 0x239   : > { %s654_s9 = scalar_lea.sflag [#allocation5], %s653_s25 }
 0x23a   : > { %884 = dma.done.wait (!%p780_p4), %s654_s9, 32  }
 0x23b   : > { %886 = vsyncadd (!%p780_p4), %s654_s9, 4294967264  ;;  %p18_p5 = scmp.ge.s32.totalorder %s971_s8, 4   ;;  %s1136_s26 = smov %s893_s27 }
 0x23c   : > { %s1137_s27 = smov %s897_s28  ;;  %s1138_s28 = smov %s984_s11 }
 0x23d   : > { %s1139_s29 = smov %s971_s8  ;;  %20 = sbr.rel (!%p18_p5) target bundleno = 5 (0x5), region = 126 }
 0x244   :  { %659 = vsyncpa [#allocation5], 1 }
 0x245   :  { %661 = vsyncpa [#allocation5 + $0x1], 1 }

</bundles_post_ra>
